<compile_context>
chip_gen: v7x
topology: tpu7x:2x2x1
jax: 0.10.0
libtpu: 0.0.40
codegen_flags: <defaults>
</compile_context>

<pallas_src>
import functools

import jax
import jax.numpy as jnp
from jax.experimental import pallas as pl
from jax.experimental.pallas import tpu as pltpu

_TINY_BYTES = 1 << 20        # single-block fast-path threshold (padded input bytes)
_VMEM_BUDGET = 24 << 20      # total double-buffered footprint target (v7x-safe)
_TARGET_IN_TILE = 8 << 20    # target padded bytes per input buffer


def _round_up(v, m):
    return ((v + m - 1) // m) * m


def _voting_kernel(x_ref, p_ref, o_ref, *, inv_voter):
    # x_ref: (TB, N) lane-dense input tile.
    # p_ref: (N, C)  constant 0/1 block-diagonal pooling matrix (resident).
    # o_ref: (TB, C)
    acc = jnp.dot(x_ref[...], p_ref[...], preferred_element_type=jnp.float32)
    o_ref[...] = (acc * jnp.float32(inv_voter)).astype(o_ref.dtype)


def voting_forward(x, voter_num, *, tile_rows=None):
    """Pallas forward of VotingLayer: grouped mean over groups of voter_num."""
    assert x.ndim == 2, "VotingLayer expects (batch, num_classes * voter_num)"
    voter_num = int(voter_num)
    if not jnp.issubdtype(x.dtype, jnp.floating):
        x = x.astype(jnp.float32)

    batch, n = x.shape
    num_classes = n // voter_num
    assert num_classes >= 1, "input width must be at least voter_num"
    usable = num_classes * voter_num

    itemsize = x.dtype.itemsize
    lane_n = _round_up(n, 128)          # padded lane width of the input row
    lane_c = _round_up(num_classes, 128)  # padded lane width of the output row

    # Constant 0/1 block-diagonal pooling matrix. Neurons beyond `usable`
    # map to no class (all-zero row) -> dropped, matching AvgPool1d
    # ceil_mode=False, without any wrapper-side slice/copy of x.
    cls_of = jnp.arange(n) // voter_num
    pool = (cls_of[:, None] == jnp.arange(num_classes)[None, :]).astype(x.dtype)

    # ---- tile selection: budget against PADDED VMEM bytes ----
    padded_row_in = lane_n * itemsize
    padded_row_out = lane_c * itemsize
    p_bytes = 2 * _round_up(n, 16) * lane_c * itemsize  # pooling matrix, 2 bufs (conservative)

    if tile_rows is not None:
        tile_b = min(int(tile_rows), batch)
    elif batch * padded_row_in <= _TINY_BYTES:
        tile_b = batch  # launch-overhead-bound regime: one block, no grid steps
    else:
        per_row = 2 * (padded_row_in + padded_row_out)  # double-buffered in + out
        budget_rows = max(8, (_VMEM_BUDGET - p_bytes) // max(per_row, 1))
        target_rows = max(8, _TARGET_IN_TILE // max(padded_row_in, 1))
        tile_b = min(batch, budget_rows, target_rows)
        if tile_b >= batch:
            # Fits in one tile but is not tiny: split into >=2 tiles so both
            # v7x TensorCores can share the parallel batch axis.
            half = _round_up(pl.cdiv(batch, 2), 8)
            tile_b = half if half < batch else batch
    if tile_b != batch and tile_b % 8 != 0:
        tile_b = max(8, (tile_b // 8) * 8)
    tile_b = min(tile_b, batch)

    grid = (pl.cdiv(batch, tile_b),)

    pad_tb = tile_b if tile_b == batch else _round_up(tile_b, 8)
    needed = (2 * pad_tb * padded_row_in + 2 * pad_tb * padded_row_out
              + p_bytes + (2 << 20))
    vmem_limit = int(min(max(needed, 8 << 20), 100 << 20))

    cost = pl.CostEstimate(
        flops=int(batch * usable),
        transcendentals=0,
        bytes_accessed=int(batch * n * itemsize
                           + batch * num_classes * itemsize
                           + n * num_classes * itemsize),
    )

    return pl.pallas_call(
        functools.partial(_voting_kernel, inv_voter=1.0 / voter_num),
        out_shape=jax.ShapeDtypeStruct((batch, num_classes), x.dtype),
        grid=grid,
        in_specs=[
            pl.BlockSpec((tile_b, n), lambda i: (i, 0)),               # streamed
            pl.BlockSpec((n, num_classes), lambda i: (0, 0)),          # resident
        ],
        out_specs=pl.BlockSpec((tile_b, num_classes), lambda i: (i, 0)),
        compiler_params=pltpu.CompilerParams(
            dimension_semantics=("parallel",),
            vmem_limit_bytes=vmem_limit),
        cost_estimate=cost,
    )(x, pool)


class VotingLayer:
    """Mirror of braincog's VotingLayer: average groups of `voter_num` neurons."""

    def __init__(self, voter_num: int):
        self.voter_num = int(voter_num)

    def __call__(self, x):
        return voting_forward(x, self.voter_num)


if __name__ == "__main__":
    key = jax.random.PRNGKey(0)
    k1, k2, k3 = jax.random.split(key, 3)

    # 1) Typical SNN readout head: 10 classes, each voted on by 10 neurons.
    batch, num_classes, voter_num = 2, 10, 10
    x = jax.random.normal(k1, (batch, num_classes * voter_num), dtype=jnp.float32)
    layer = VotingLayer(voter_num)
    y = layer(x)
    jax.block_until_ready(y)
    ref = x.reshape(batch, num_classes, voter_num).mean(axis=-1)
    assert y.shape == (batch, num_classes)
    assert jnp.allclose(y, ref, atol=1e-5, rtol=1e-5)

    # 2) Multi-tile / ragged-batch grid path (grid = cdiv(50, 16) = 4).
    batch2 = 50
    x2 = jax.random.normal(k2, (batch2, num_classes * voter_num), dtype=jnp.float32)
    y2 = voting_forward(x2, voter_num, tile_rows=16)
    jax.block_until_ready(y2)
    ref2 = x2.reshape(batch2, num_classes, voter_num).mean(axis=-1)
    assert y2.shape == (batch2, num_classes)
    assert jnp.allclose(y2, ref2, atol=1e-5, rtol=1e-5)

    # 3) Width not a multiple of voter_num: trailing neurons dropped in-kernel
    #    (zero rows of the pooling matrix), no wrapper slice/copy of x.
    batch3, n3 = 4, 103  # usable = 100, last 3 neurons ignored
    x3 = jax.random.normal(k3, (batch3, n3), dtype=jnp.float32)
    y3 = voting_forward(x3, voter_num)
    jax.block_until_ready(y3)
    ref3 = x3[:, :100].reshape(batch3, num_classes, voter_num).mean(axis=-1)
    assert y3.shape == (batch3, num_classes)
    assert jnp.allclose(y3, ref3, atol=1e-5, rtol=1e-5)

    print("KERNEL_OK")
</pallas_src>

<mosaic_0001>
module attributes {stable_mosaic.version = 11 : i64} {
  func.func @_voting_kernel(%arg0: i32, %arg1: memref<2x100xf32, #tpu.memory_space<vmem>>, %arg2: memref<100x10xf32, #tpu.memory_space<vmem>>, %arg3: memref<2x10xf32, #tpu.memory_space<vmem>>) attributes {dimension_semantics = [#tpu.dimension_semantics<parallel>], iteration_bounds = array<i64: 1>, scalar_prefetch = 0 : i64, scratch_operands = 0 : i64, tpu.core_type = #tpu.core_type<tc>, window_params = [{transform_indices = @transform_0, window_bounds = array<i64: 2, 100>}, {pipeline_mode = #tpu.pipeline_mode<synchronous>, transform_indices = @transform_1, window_bounds = array<i64: 100, 10>}, {transform_indices = @transform_2, window_bounds = array<i64: 2, 10>}]} {
    %c0 = arith.constant 0 : index
    %c0_0 = arith.constant 0 : index
    %0 = vector.load %arg1[%c0, %c0_0] : memref<2x100xf32, #tpu.memory_space<vmem>>, vector<2x100xf32>
    %c0_1 = arith.constant 0 : index
    %c0_2 = arith.constant 0 : index
    %1 = vector.load %arg2[%c0_1, %c0_2] : memref<100x10xf32, #tpu.memory_space<vmem>>, vector<100x10xf32>
    %cst = arith.constant dense<0.000000e+00> : vector<2x10xf32>
    %2 = tpu.matmul %0, %1, %cst {dimension_numbers = #tpu.dot_dimension_numbers<[1], [0], [0], [1], [0, 0, 1, 1], [], []>} : vector<2x100xf32>, vector<100x10xf32>, vector<2x10xf32> -> vector<2x10xf32>
    %cst_3 = arith.constant 1.000000e-01 : f32
    %3 = vector.broadcast %cst_3 : f32 to vector<2x10xf32>
    %4 = arith.mulf %2, %3 : vector<2x10xf32>
    %c0_4 = arith.constant 0 : index
    %c0_5 = arith.constant 0 : index
    %5 = vector.load %arg3[%c0_4, %c0_5] : memref<2x10xf32, #tpu.memory_space<vmem>>, vector<2x10xf32>
    tpu.vector_store %arg3[%c0_4, %c0_5], %4 {strides = array<i32>} : memref<2x10xf32, #tpu.memory_space<vmem>>, vector<2x10xf32>,
    return
  }
  func.func @transform_0(%arg0: i32) -> (i32, i32) {
    %c0_i32 = arith.constant 0 : i32
    %c0_i32_0 = arith.constant 0 : i32
    return %arg0, %c0_i32 : i32, i32
  }
  func.func @transform_1(%arg0: i32) -> (i32, i32) {
    %c0_i32 = arith.constant 0 : i32
    %c0_i32_0 = arith.constant 0 : i32
    %c0_i32_1 = arith.constant 0 : i32
    return %c0_i32, %c0_i32_0 : i32, i32
  }
  func.func @transform_2(%arg0: i32) -> (i32, i32) {
    %c0_i32 = arith.constant 0 : i32
    %c0_i32_0 = arith.constant 0 : i32
    return %arg0, %c0_i32 : i32, i32
  }
}

</mosaic_0001>

<bundles_post_ra>
// kernel: tpu_custom_call.1
= control target key start
LH: loop header
LB: loop body
LE: loop exit
PB: predicated region body
PF: predicated region fallthrough
CT: control target
= control target key end

     0   :  { %v212_v3 = vmov 0.0|0.0   ;;  %vm213_vm0 = vmmov 0   ;;  %v214_v6 = vmov 0.0   ;;  %s285_s0 = inlined_call_operand.vmem [shape: f32[2,100], index: 0, kind: input, shape index: {}]   ;;  %s286_s1 = inlined_call_operand.vmem [shape: f32[100,10], index: 1, kind: input, shape index: {}]   ;;  %s287_s2 = inlined_call_operand.hbm [shape: f32[2,10], index: 2, kind: output, shape index: {}]  }
   0x1   :  { %v13_v0 = vld [vmem:[%s286_s1] sm:$0xff]  ;;  %v14_v1 = vld [vmem:[%s286_s1 + $0x8] sm:$0xff]  ;;  %v15_v2 = vld [vmem:[%s286_s1 + $0x10] sm:$0xff]  ;;  %166 = vmatprep.subr.bf16.mxu0 %v212_v3  ;;  %163 = vmatprep.mubr.msk.f32.mxu0 %vm213_vm0, %v214_v6 }
   0x2   :  { %v167_v4 = vpack.c.bf16 %v14_v1, %v13_v0  ;;  %v16_v5 = vld [vmem:[%s286_s1 + $0x18] sm:$0xff]  ;;  %v17_v8 = vld [vmem:[%s286_s1 + $0x20] sm:$0xff]  ;;  %v18_v9 = vld [vmem:[%s286_s1 + $0x28] sm:$0xff] }
   0x3   :  { %v170_v7 = vpack.c.bf16 %v16_v5, %v15_v2 }
   0x4   :  { %168 = vmatpush3.bf16.msra.mxu0 %v167_v4 }
   0x5   :  { %169 = vmatprep.subr.bf16.mxu0 %v212_v3 }
   0x6   :  { %7 = vsyncpa [#allocation3], 0  ;;  %v173_v10 = vpack.c.bf16 %v18_v9, %v17_v8  ;;  %v19_v11 = vld [vmem:[%s286_s1 + $0x30] sm:$0xff]  ;;  %v20_v12 = vld [vmem:[%s286_s1 + $0x38] sm:$0xff]  ;;  %vm30_vm1 = vcmask 1043456   ;;  %vm26_vm2 = vcmask 818176  }
   0x7   :  { %v176_v13 = vpack.c.bf16 %v20_v12, %v19_v11  ;;  %v21_v14 = vld [vmem:[%s286_s1 + $0x40] sm:$0xff]  ;;  %v22_v15 = vld [vmem:[%s286_s1 + $0x48] sm:$0xff]  ;;  %v23_v17 = vld [vmem:[%s286_s1 + $0x50] sm:$0xff]  ;;  %s215_s9 = smov [#allocation2]   ;;  %vm105_vm3 = vcmask 74752  }
   0x8   :  { %171 = vmatpush3.bf16.msra.mxu0 %v170_v7  ;;  %v179_v16 = vpack.c.bf16 %v22_v15, %v21_v14  ;;  %v24_v18 = vld [vmem:[%s286_s1 + $0x58] sm:$0xff]  ;;  %v25_v20 = vld [vmem:[%s286_s1 + $0x60] sm:$0xf]  ;;  %s113_s10 = sshll.u32 %s215_s9, 4  ;;  %s114_s10 = int_to_ptr.vmem [resolvable:$true] %s113_s10 }
   0x9   :  { %172 = vmatprep.subr.bf16.mxu0 %v212_v3  ;;  %v182_v19 = vpack.c.bf16 %v24_v18, %v23_v17  ;;  %v12_v21 = vld [vmem:[%s285_s0] sm:$0x3]  ;;  %s188_s11 = scalar_lea.vmem %s114_s10, 32  ;;  %p193_p1 = scmp.lt.s32.totalorder %s114_s10, %s114_s10 }
   0xa   :  { %p189_p0 = scmp.ne.s32.totalorder %s114_s10, %s188_s11  ;;  %p194_p2 = scmp.lt.s32.totalorder %s188_s11, %s188_s11 }
   0xc   :  { %174 = vmatpush3.bf16.msra.mxu0 %v173_v10  ;;  %p195_p3 = por %p194_p2, %p193_p1 }
   0xd   :  { %175 = vmatprep.subr.bf16.mxu0 %v212_v3 }
   0xe   :  { %p196_p4 = pnand %p195_p3, %p189_p0 }
  0x10   :  { %177 = vmatpush3.bf16.msra.mxu0 %v176_v13 }
  0x11   :  { %178 = vmatprep.subr.bf16.mxu0 %v212_v3 }
  0x14   :  { %180 = vmatpush3.bf16.msra.mxu0 %v179_v16 }
  0x15   :  { %181 = vmatprep.subr.bf16.mxu0 %v212_v3 }
  0x18   :  { %183 = vmatpush3.bf16.msra.mxu0 %v182_v19 }
  0x19   :  { %161 = vmatprep.subr.mxu0 %v214_v6 }
  0x1c   :  { %162 = vmatpush3.msk.msra.mxu0 %vm30_vm1, %v25_v20 }
  0x1d   :  { %164 = vmatmul.mubr.msk.f32.vlgmr.msra.gmra.mrb[0].mxu0 %vm26_vm2, %v12_v21 }
  0xf0   :  { %v100_v22 = vpop.f32.mrb[0].mxu0 }
  0xf1   :  { %v104_v23 = vmul.f32 0.1, %v100_v22  ;;  %v165_v24 = vpop.f32.mrb[1].mxu0 }
  0xf3   :  { %106 = vst.msk [vmem:[#allocation2] sm:$0x3] %vm105_vm3, %v104_v23 }
  0xf4   :  { %199 = shalt.err (!%p196_p4)
}
  0xf5   :  { %s200_s12 = scalar_lea.hbm %s287_s2, 32 }
  0xf6   :  { %p201_p5 = scmp.ne.s32.totalorder %s287_s2, %s200_s12  ;;  %p204_p6 = scmp.lt.u32.totalorder %s200_s12, %s287_s2 }
  0xf8   :  { %p206_p7 = pnand %p204_p6, %p201_p5 }
  0xfa   :  { %209 = shalt.err (!%p206_p7)
}
  0xfb   :  { %116 = dma.vmem_to_hbm [thread:$0]  %s114_s10, 32, %s287_s2, [#allocation3]  }
  0xfc   :  { %210 = dma.done.wait [#allocation3], 32  }
  0xfd   :  { %211 = vsyncadd [#allocation3], 4294967264 }
  0xfe   :  { %120 = vsyncpa [#allocation3], 1 }

</bundles_post_ra>
